<compile_context>
chip_gen: v7x
topology: tpu7x:2x2x1
jax: 0.10.0
libtpu: 0.0.40
codegen_flags: <defaults>
</compile_context>

<pallas_src>
import jax
import jax.numpy as jnp
from jax.experimental import pallas as pl
from jax.experimental.pallas import tpu as pltpu

_LANE = 128


def _dice_partial_kernel(x_ref, t_ref, inter_ref, psum_ref, tcnt_ref):
    """One grid step = one (batch item, pixel tile).

    x_ref:     (1, C, TPSUB, 128) logits
    t_ref:     (1, 1, TPSUB, 128) int32 class ids (-1 marks padded pixels)
    inter_ref: (1, 1, C, 128) f32  sum over tile pixels of softmax_prob * onehot
    psum_ref:  (1, 1, C, 128) f32  sum over tile pixels of softmax_prob (valid pixels only)
    tcnt_ref:  (1, 1, C, 128) f32  per-class valid-pixel count
    """
    x = x_ref[0].astype(jnp.float32)          # (C, TPSUB, 128)
    t = t_ref[0]                              # (1, TPSUB, 128) int32

    # Softmax over the channel (leading slab) axis -> elementwise VPU work only.
    m = jnp.max(x, axis=0, keepdims=True)     # (1, TPSUB, 128)
    e = jnp.exp(x - m)                        # (C, TPSUB, 128)
    inv = pl.reciprocal(jnp.sum(e, axis=0, keepdims=True), approx=False)
    probs = e * inv                           # (C, TPSUB, 128)

    class_ids = jax.lax.broadcasted_iota(jnp.int32, x.shape, 0)  # (C, TPSUB, 128)
    hit = class_ids == t                      # one-hot mask, no f32 slab
    valid = t >= 0                            # (1, TPSUB, 128); False on padded pixels

    zero = jnp.float32(0.0)
    inter = jnp.sum(jnp.where(hit, probs, zero), axis=1)       # (C, 128) lane partials
    psum = jnp.sum(jnp.where(valid, probs, zero), axis=1)      # (C, 128)
    tcnt = jnp.sum(hit.astype(jnp.float32), axis=1)            # (C, 128)

    inter_ref[0, 0] = inter
    psum_ref[0, 0] = psum
    tcnt_ref[0, 0] = tcnt


def dice_loss(logits, targets, *, smooth=1.0, eps=1e-7, tile_rows=32):
    """Multiclass soft dice loss == smp.losses.DiceLoss(mode='multiclass', smooth=1).

    logits: (N, C, H, W) float; targets: (N, H, W) integer class ids in [0, C).
    """
    N, C, H, W = logits.shape
    P = H * W
    rows = -(-P // _LANE)                     # ceil(P / 128) pixel rows of 128 lanes
    tpsub = min(tile_rows, rows)              # sublane extent per tile (32 -> 4096 px)
    rows_pad = -(-rows // tpsub) * tpsub
    p_pad = rows_pad * _LANE
    pt = rows_pad // tpsub                    # pixel tiles per batch item

    x = logits.reshape(N, C, P)
    t = targets.reshape(N, P).astype(jnp.int32)
    if p_pad != P:
        x = jnp.pad(x, ((0, 0), (0, 0), (0, p_pad - P)))
        t = jnp.pad(t, ((0, 0), (0, p_pad - P)), constant_values=-1)
    x = x.reshape(N, C, rows_pad, _LANE)
    t = t.reshape(N, 1, rows_pad, _LANE)

    part_shape = jax.ShapeDtypeStruct((N, pt, C, _LANE), jnp.float32)
    part_spec = pl.BlockSpec((1, 1, C, _LANE), lambda n, p: (n, p, 0, 0))

    inter, psum, tcnt = pl.pallas_call(
        _dice_partial_kernel,
        out_shape=(part_shape, part_shape, part_shape),
        grid_spec=pltpu.PrefetchScalarGridSpec(
            num_scalar_prefetch=0,
            grid=(N, pt),
            in_specs=[
                pl.BlockSpec((1, C, tpsub, _LANE), lambda n, p: (n, 0, p, 0)),
                pl.BlockSpec((1, 1, tpsub, _LANE), lambda n, p: (n, 0, p, 0)),
            ],
            out_specs=(part_spec, part_spec, part_spec),
        ),
        compiler_params=pltpu.CompilerParams(
            dimension_semantics=("parallel", "parallel")),
    )(x, t)

    # Tiny final reduce + dice math (a few KB) in plain JAX.
    inter = jnp.sum(inter, axis=(0, 1, 3))    # (C,)
    psum = jnp.sum(psum, axis=(0, 1, 3))      # (C,)
    tcnt = jnp.sum(tcnt, axis=(0, 1, 3))      # (C,)
    card = psum + tcnt                        # == sum(probs + onehot)
    dice = (2.0 * inter + smooth) / jnp.maximum(card + smooth, eps)
    per_class_loss = (1.0 - dice) * (tcnt > 0).astype(jnp.float32)
    # classes=None -> mean over all C classes (absent classes contribute 0 to numerator).
    return jnp.mean(per_class_loss)


def _dice_loss_ref(logits, targets, smooth=1.0, eps=1e-7):
    """Pure-JAX reference replicating smp.losses.DiceLoss(mode='multiclass', smooth=1)."""
    N, C, H, W = logits.shape
    probs = jax.nn.softmax(logits.astype(jnp.float32), axis=1).reshape(N, C, -1)
    onehot = jax.nn.one_hot(targets.reshape(N, -1), C, dtype=jnp.float32)  # (N, P, C)
    onehot = jnp.transpose(onehot, (0, 2, 1))                              # (N, C, P)
    dims = (0, 2)
    inter = jnp.sum(probs * onehot, axis=dims)
    card = jnp.sum(probs + onehot, axis=dims)
    dice = (2.0 * inter + smooth) / jnp.maximum(card + smooth, eps)
    loss = 1.0 - dice
    mask = (jnp.sum(onehot, axis=dims) > 0).astype(loss.dtype)
    return jnp.mean(loss * mask)


if __name__ == "__main__":
    key = jax.random.PRNGKey(0)

    # Case 1: small, 128-aligned pixel count.
    k1, k2, k3, k4 = jax.random.split(key, 4)
    N, C, H, W = 2, 4, 16, 16
    logits = jax.random.normal(k1, (N, C, H, W), dtype=jnp.float32)
    targets = jax.random.randint(k2, (N, H, W), 0, C, dtype=jnp.int32)
    loss = jax.block_until_ready(dice_loss(logits, targets))
    ref = jax.block_until_ready(_dice_loss_ref(logits, targets))
    assert jnp.allclose(loss, ref, atol=1e-5, rtol=1e-5), (loss, ref)

    # Case 2: non-128-multiple pixel count exercises the padding/masking path.
    N2, C2, H2, W2 = 2, 5, 9, 13
    logits2 = jax.random.normal(k3, (N2, C2, H2, W2), dtype=jnp.float32)
    targets2 = jax.random.randint(k4, (N2, H2, W2), 0, C2, dtype=jnp.int32)
    loss2 = jax.block_until_ready(dice_loss(logits2, targets2))
    ref2 = jax.block_until_ready(_dice_loss_ref(logits2, targets2))
    assert jnp.allclose(loss2, ref2, atol=1e-5, rtol=1e-5), (loss2, ref2)

    print("KERNEL_OK")
</pallas_src>

<mosaic_0001>
module attributes {stable_mosaic.version = 11 : i64} {
  func.func @_dice_partial_kernel(%arg0: i32, %arg1: i32, %arg2: memref<1x4x2x128xf32, #tpu.memory_space<vmem>>, %arg3: memref<1x1x2x128xi32, #tpu.memory_space<vmem>>, %arg4: memref<1x1x4x128xf32, #tpu.memory_space<vmem>>, %arg5: memref<1x1x4x128xf32, #tpu.memory_space<vmem>>, %arg6: memref<1x1x4x128xf32, #tpu.memory_space<vmem>>) attributes {dimension_semantics = [#tpu.dimension_semantics<parallel>, #tpu.dimension_semantics<parallel>], iteration_bounds = array<i64: 2, 1>, scalar_prefetch = 0 : i64, scratch_operands = 0 : i64, tpu.core_type = #tpu.core_type<tc>, window_params = [{transform_indices = @transform_0, window_bounds = array<i64: 1, 4, 2, 128>}, {transform_indices = @transform_1, window_bounds = array<i64: 1, 1, 2, 128>}, {transform_indices = @transform_2, window_bounds = array<i64: 1, 1, 4, 128>}, {transform_indices = @transform_3, window_bounds = array<i64: 1, 1, 4, 128>}, {transform_indices = @transform_4, window_bounds = array<i64: 1, 1, 4, 128>}]} {
    %c0 = arith.constant 0 : index
    %c0_0 = arith.constant 0 : index
    %c0_1 = arith.constant 0 : index
    %c0_2 = arith.constant 0 : index
    %0 = vector.load %arg2[%c0, %c0_0, %c0_1, %c0_2] : memref<1x4x2x128xf32, #tpu.memory_space<vmem>>, vector<1x4x2x128xf32>
    %1 = vector.shape_cast %0 : vector<1x4x2x128xf32> to vector<4x2x128xf32>
    %c0_3 = arith.constant 0 : index
    %c0_4 = arith.constant 0 : index
    %c0_5 = arith.constant 0 : index
    %c0_6 = arith.constant 0 : index
    %2 = vector.load %arg3[%c0_3, %c0_4, %c0_5, %c0_6] : memref<1x1x2x128xi32, #tpu.memory_space<vmem>>, vector<1x1x2x128xi32>
    %3 = vector.shape_cast %2 : vector<1x1x2x128xi32> to vector<1x2x128xi32>
    %cst = arith.constant dense<0xFF800000> : vector<2x128xf32>
    %4 = vector.multi_reduction <maximumf>, %1, %cst [0] : vector<4x2x128xf32> to vector<2x128xf32>
    %5 = vector.shape_cast %4 : vector<2x128xf32> to vector<1x2x128xf32>
    %6 = vector.broadcast %5 : vector<1x2x128xf32> to vector<4x2x128xf32>
    %7 = arith.subf %1, %6 : vector<4x2x128xf32>
    %8 = math.exp %7 : vector<4x2x128xf32>
    %cst_7 = arith.constant dense<0.000000e+00> : vector<2x128xf32>
    %9 = vector.multi_reduction <add>, %8, %cst_7 [0] : vector<4x2x128xf32> to vector<2x128xf32>
    %10 = vector.shape_cast %9 : vector<2x128xf32> to vector<1x2x128xf32>
    %11 = tpu.reciprocal %10 : vector<1x2x128xf32> -> vector<1x2x128xf32>
    %12 = vector.broadcast %11 : vector<1x2x128xf32> to vector<4x2x128xf32>
    %13 = arith.mulf %8, %12 : vector<4x2x128xf32>
    %14 = tpu.iota {dimensions = array<i32: 0>} : vector<4x2x128xi32>
    %15 = vector.broadcast %3 : vector<1x2x128xi32> to vector<4x2x128xi32>
    %16 = arith.cmpi eq, %14, %15 : vector<4x2x128xi32>
    %c0_i32 = arith.constant 0 : i32
    %17 = vector.broadcast %c0_i32 : i32 to vector<1x2x128xi32>
    %18 = arith.cmpi sge, %3, %17 : vector<1x2x128xi32>
    %cst_8 = arith.constant 0.000000e+00 : f32
    %19 = vector.broadcast %cst_8 : f32 to vector<4x2x128xf32>
    %20 = arith.select %16, %13, %19 : vector<4x2x128xi1>, vector<4x2x128xf32>
    %cst_9 = arith.constant dense<0.000000e+00> : vector<4x128xf32>
    %21 = vector.multi_reduction <add>, %20, %cst_9 [1] : vector<4x2x128xf32> to vector<4x128xf32>
    %cst_10 = arith.constant 0.000000e+00 : f32
    %22 = vector.shape_cast %18 : vector<1x2x128xi1> to vector<1x2x128xi1>
    %23 = vector.broadcast %22 : vector<1x2x128xi1> to vector<4x2x128xi1>
    %24 = vector.broadcast %cst_10 : f32 to vector<4x2x128xf32>
    %25 = arith.select %23, %13, %24 : vector<4x2x128xi1>, vector<4x2x128xf32>
    %cst_11 = arith.constant dense<0.000000e+00> : vector<4x128xf32>
    %26 = vector.multi_reduction <add>, %25, %cst_11 [1] : vector<4x2x128xf32> to vector<4x128xf32>
    %27 = arith.extui %16 : vector<4x2x128xi1> to vector<4x2x128xi32>
    %28 = arith.sitofp %27 : vector<4x2x128xi32> to vector<4x2x128xf32>
    %cst_12 = arith.constant dense<0.000000e+00> : vector<4x128xf32>
    %29 = vector.multi_reduction <add>, %28, %cst_12 [1] : vector<4x2x128xf32> to vector<4x128xf32>
    %c0_13 = arith.constant 0 : index
    %c0_14 = arith.constant 0 : index
    %c0_15 = arith.constant 0 : index
    %c0_16 = arith.constant 0 : index
    %30 = vector.load %arg4[%c0_13, %c0_14, %c0_15, %c0_16] : memref<1x1x4x128xf32, #tpu.memory_space<vmem>>, vector<1x1x4x128xf32>
    %31 = vector.shape_cast %30 : vector<1x1x4x128xf32> to vector<4x128xf32>
    %32 = vector.shape_cast %21 : vector<4x128xf32> to vector<1x1x4x128xf32>
    tpu.vector_store %arg4[%c0_13, %c0_14, %c0_15, %c0_16], %32 {strides = array<i32>} : memref<1x1x4x128xf32, #tpu.memory_space<vmem>>, vector<1x1x4x128xf32>,
    %c0_17 = arith.constant 0 : index
    %c0_18 = arith.constant 0 : index
    %c0_19 = arith.constant 0 : index
    %c0_20 = arith.constant 0 : index
    %33 = vector.load %arg5[%c0_17, %c0_18, %c0_19, %c0_20] : memref<1x1x4x128xf32, #tpu.memory_space<vmem>>, vector<1x1x4x128xf32>
    %34 = vector.shape_cast %33 : vector<1x1x4x128xf32> to vector<4x128xf32>
    %35 = vector.shape_cast %26 : vector<4x128xf32> to vector<1x1x4x128xf32>
    tpu.vector_store %arg5[%c0_17, %c0_18, %c0_19, %c0_20], %35 {strides = array<i32>} : memref<1x1x4x128xf32, #tpu.memory_space<vmem>>, vector<1x1x4x128xf32>,
    %c0_21 = arith.constant 0 : index
    %c0_22 = arith.constant 0 : index
    %c0_23 = arith.constant 0 : index
    %c0_24 = arith.constant 0 : index
    %36 = vector.load %arg6[%c0_21, %c0_22, %c0_23, %c0_24] : memref<1x1x4x128xf32, #tpu.memory_space<vmem>>, vector<1x1x4x128xf32>
    %37 = vector.shape_cast %36 : vector<1x1x4x128xf32> to vector<4x128xf32>
    %38 = vector.shape_cast %29 : vector<4x128xf32> to vector<1x1x4x128xf32>
    tpu.vector_store %arg6[%c0_21, %c0_22, %c0_23, %c0_24], %38 {strides = array<i32>} : memref<1x1x4x128xf32, #tpu.memory_space<vmem>>, vector<1x1x4x128xf32>,
    return
  }
  func.func @transform_0(%arg0: i32, %arg1: i32) -> (i32, i32, i32, i32) {
    %c0_i32 = arith.constant 0 : i32
    %c0_i32_0 = arith.constant 0 : i32
    %c0_i32_1 = arith.constant 0 : i32
    return %arg0, %c0_i32, %arg1, %c0_i32_0 : i32, i32, i32, i32
  }
  func.func @transform_1(%arg0: i32, %arg1: i32) -> (i32, i32, i32, i32) {
    %c0_i32 = arith.constant 0 : i32
    %c0_i32_0 = arith.constant 0 : i32
    %c0_i32_1 = arith.constant 0 : i32
    return %arg0, %c0_i32, %arg1, %c0_i32_0 : i32, i32, i32, i32
  }
  func.func @transform_2(%arg0: i32, %arg1: i32) -> (i32, i32, i32, i32) {
    %c0_i32 = arith.constant 0 : i32
    %c0_i32_0 = arith.constant 0 : i32
    %c0_i32_1 = arith.constant 0 : i32
    return %arg0, %arg1, %c0_i32, %c0_i32_0 : i32, i32, i32, i32
  }
  func.func @transform_3(%arg0: i32, %arg1: i32) -> (i32, i32, i32, i32) {
    %c0_i32 = arith.constant 0 : i32
    %c0_i32_0 = arith.constant 0 : i32
    %c0_i32_1 = arith.constant 0 : i32
    return %arg0, %arg1, %c0_i32, %c0_i32_0 : i32, i32, i32, i32
  }
  func.func @transform_4(%arg0: i32, %arg1: i32) -> (i32, i32, i32, i32) {
    %c0_i32 = arith.constant 0 : i32
    %c0_i32_0 = arith.constant 0 : i32
    %c0_i32_1 = arith.constant 0 : i32
    return %arg0, %arg1, %c0_i32, %c0_i32_0 : i32, i32, i32, i32
  }
}

</mosaic_0001>

<bundles_post_ra>
// kernel: tpu_custom_call.1
= control target key start
LH: loop header
LB: loop body
LE: loop exit
PB: predicated region body
PF: predicated region fallthrough
CT: control target
= control target key end

     0   :  { %s1408_s0 = inlined_call_operand.hbm [shape: f32[2,4,2,128], index: 0, kind: input, shape index: {}]   ;;  %s1409_s1 = inlined_call_operand.hbm [shape: s32[2,1,2,128], index: 1, kind: input, shape index: {}]   ;;  %s1410_s2 = inlined_call_operand.hbm [shape: f32[2,1,4,128], index: 2, kind: output, shape index: {0}]   ;;  %s1411_s3 = inlined_call_operand.hbm [shape: f32[2,1,4,128], index: 3, kind: output, shape index: {1}]   ;;  %s1412_s4 = inlined_call_operand.hbm [shape: f32[2,1,4,128], index: 4, kind: output, shape index: {2}]  }
   0x1   :  { %1416 = sst [smem:[#allocation15_spill]] %s1408_s0 }
   0x2   :  { %10 = vsyncpa [#allocation3], 0 }
   0x3   :  { %12 = vsyncpa [#allocation3 + $0x1], 0 }
   0x4   :  { %13 = vsyncpa [#allocation6], 0 }
   0x5   :  { %15 = vsyncpa [#allocation6 + $0x1], 0 }
   0x6   :  { %16 = vsyncpa [#allocation4], 0 }
   0x7   :  { %18 = vsyncpa [#allocation4 + $0x1], 0 }
   0x8   :  { %19 = vsyncpa [#allocation9], 0 }
   0x9   :  { %21 = vsyncpa [#allocation9 + $0x1], 0  ;;  %s1049_s15 = smov 0   ;;  %s1051_s16 = smov 0  }
   0xa   :  { %s1053_s17 = smov 0   ;;  %s1055_s18 = smov 0  }
   0xb   :  { %s1057_s19 = smov 0   ;;  %s1059_s20 = smov 0  }
   0xc LB: > { %s1080_s21 = sadd.s32 4294967295, %s1014_s20   ;;  %s1414_s22 = sadd.s32 4294967294, %s1014_s20   ;;  %s1014_s20 = sphi %s1059_s20, %s27_s20   ;;  %s1010_s19 = sphi %s1057_s19, %s1435_s19   ;;  %s1006_s18 = sphi %s1055_s18, %s1434_s18   ;;  %s1002_s17 = sphi %s1053_s17, %s1433_s17   ;;  %s998_s16 = sphi %s1051_s16, %s1432_s16   ;;  %s994_s15 = sphi %s1049_s15, %s1431_s15  }
   0xd   : > { %s39_s23 = sadd.s32 1, %s1010_s19  ;;  %s48_s24 = sadd.s32 1, %s1002_s17 }
   0xe   : > { %p41_p0 = scmp.ge.s32.totalorder %s39_s23, 2  ;;  %p55_p1 = scmp.ne.s32.totalorder %s1002_s17, %s998_s16 }
   0xf   : > { %p56_p2 = scmp.eq.s32.totalorder %s1014_s20, 0  ;;  %p61_p3 = scmp.ne.s32.totalorder %s998_s16, %s994_s15 }
  0x10   : > { %s1437_s23 = smov (%p41_p0, %s39_s23), 0  ;;  %p62_p5 = scmp.eq.s32.totalorder %s1080_s21, 0 }
  0x11   : > { %p1092_p4 = por %p56_p2, %p55_p1  ;;  %s43_s26 = ssub.s32 %s1010_s19, %s1437_s23 }
  0x12   : > { %p115_p6 = scmp.eq.s32.totalorder %s1080_s21, 1  ;;  %p46_p7 = scmp.eq.s32.totalorder %s43_s26, 0 }
  0x13   : > { %p1100_p8 = por %p62_p5, %p61_p3  ;;  %p121_p10 = scmp.eq.s32.totalorder %s1414_s22, 1 }
  0x14   : > { %p1104_p9 = por %p115_p6, %p55_p1  ;;  %p745_p13 = scmp.lt.s32.totalorder %s1014_s20, 2 }
  0x15   : > { %s1418_s27 = scalar_select %p1100_p8, 1, 0 }
  0x16   : > { %s1419_s28 = scalar_select %p1104_p9, 1, 0 }
  0x17   : > { %s1111_s29 = scalar_select %p46_p7, %s1002_s17, %s48_s24  }
  0x18   : > { %p1113_p11 = por %p121_p10, %p61_p3  ;;  %s1120_s5 = sand.u32 1, %s1002_s17  }
  0x19   : > { %s694_s6 = sshll.u32 %s1120_s5, 3  ;;  %s717_s7 = sshll.u32 %s1010_s19, 7 }
  0x1a   : > { %s1420_s30 = scalar_select %p1113_p11, 1, 0 }
  0x1b   : > { %s1421_s0 = sld [smem:[#allocation15_spill]]  ;;  %s201_s11 = scalar_lea.vmem [#allocation2], %s694_s6 }
  0x1c   : > { %s209_s12 = sshll.u32 %s201_s11, 4  ;;  %p1133_p0 = pnand %p745_p13, %p1092_p4  ;;  %s1129_s12 = int_to_ptr.vmem [resolvable:$true] %s209_s12 }
  0x1d   : > { %s198_s14 = scalar_lea.sflag [#allocation3], %s1120_s5 }
  0x1e   : > { %p810_p3 = pneg %p1133_p0 }
  0x21   : > { %s1127_s10 = scalar_lea.hbm %s1421_s0, %s717_s7  ;;  %s813_s25 = scalar_lea.hbm %s1421_s0, 256 }
  0x22   : > { %s808_s24 = scalar_lea.hbm %s1127_s10, 128  ;;  %p814_p4 = scmp.lt.u32.totalorder %s1127_s10, %s1421_s0 }
  0x23   : > { %p809_p2 = scmp.ne.s32.totalorder %s1127_s10, %s808_s24  ;;  %p815_p7 = scmp.lt.u32.totalorder %s813_s25, %s808_s24 }
  0x24   : > { %p817_p13 = scmp.lt.u32.totalorder %s808_s24, %s1127_s10 }
  0x25   : > { %p811_p5 = pnand %p810_p3, %p809_p2  ;;  %p816_p10 = por %p815_p7, %p814_p4 }
  0x27   : > { %p812_p6 = pneg %p811_p5  ;;  %p818_p12 = por %p817_p13, %p816_p10 }
  0x29   : > { %p819_p1 = pnand %p818_p12, %p812_p6 }
  0x2b   : > { %822 = shalt.err (!%p819_p1)
}
  0x2c   : > { %s823_s9 = scalar_lea.vmem %s1129_s12, 128  ;;  %s1016_s11 = smov [#allocation2]  }
  0x2d   : > { %p824_p2 = scmp.ne.s32.totalorder %s1129_s12, %s823_s9  ;;  %s828_s26 = sshll.u32 %s1016_s11, 4  ;;  %s829_s26 = int_to_ptr.vmem [resolvable:$false] %s828_s26 }
  0x2e   : > { %s830_s6 = scalar_lea.vmem %s829_s26, 256  ;;  %p831_p9 = scmp.lt.s32.totalorder %s1129_s12, %s829_s26 }
  0x2f   : > { %p826_p5 = pnand %p824_p2, %p810_p3  ;;  %p832_p4 = scmp.lt.s32.totalorder %s830_s6, %s823_s9 }
  0x31   : > { %p827_p11 = pneg %p826_p5  ;;  %p833_p7 = por %p832_p4, %p831_p9 }
  0x33   : > { %p834_p10 = pnand %p833_p7, %p827_p11 }
  0x35   : > { %837 = shalt.err (!%p834_p10)
}
  0x36   : > { %s1017_s24 = smov 32   ;;  %s1018_s25 = smov 2  }
  0x37   : > { %731 = dma.hbm_to_vmem [thread:$0]  (!%p1133_p0), %s1127_s10, 128, %s1129_s12, %s198_s14, %s1017_s24, %s1017_s24, %s1018_s25  }
  0x38   : > { %p236_p12 = scmp.lt.s32.totalorder %s1014_s20, 3  ;;  %s697_s7 = sshll.u32 %s1120_s5, 1 }
  0x39   : > { %s698_s8 = sshll.u32 %s1010_s19, 5  ;;  %p1423_p9 = scmp.ge.s32.totalorder %s1014_s20, 1 }
  0x3a   : > { %s1178_s6 = scalar_lea.hbm %s1409_s1, %s698_s8  ;;  %s223_s22 = scalar_lea.vmem [#allocation5], %s697_s7 }
  0x3b   : > { %p1171_p11 = pnand %p1423_p9, %p236_p12  ;;  %s231_s0 = sshll.u32 %s223_s22, 4  ;;  %s232_s0 = int_to_ptr.vmem [resolvable:$true] %s231_s0 }
  0x3c   : > { %s220_s10 = scalar_lea.sflag [#allocation6], %s1120_s5  ;;  %s838_s12 = scalar_lea.hbm %s1178_s6, 32 }
  0x3d   : > { %s1424_s9 = scalar_select %p1171_p11, 1, 0 }
  0x3e   : > { %p839_p1 = scmp.ne.s32.totalorder %s1178_s6, %s838_s12  ;;  %s843_s25 = scalar_lea.hbm %s1409_s1, 64 }
  0x3f   : > { %p844_p2 = scmp.lt.u32.totalorder %s1178_s6, %s1409_s1  ;;  %p845_p5 = scmp.lt.u32.totalorder %s843_s25, %s838_s12 }
  0x40   : > { %p841_p6 = pnand %p839_p1, %p810_p3  ;;  %p847_p7 = scmp.lt.u32.totalorder %s838_s12, %s1178_s6 }
  0x41   : > { %p846_p4 = por %p845_p5, %p844_p2 }
  0x42   : > { %p842_p13 = pneg %p841_p6 }
  0x43   : > { %p848_p10 = por %p847_p7, %p846_p4 }
  0x45   : > { %p849_p12 = pnand %p848_p10, %p842_p13 }
  0x47   : > { %852 = shalt.err (!%p849_p12)
}
  0x48   : > { %s853_s22 = scalar_lea.vmem %s232_s0, 32  ;;  %s1019_s5 = smov [#allocation5]  }
  0x49   : > { %p854_p9 = scmp.ne.s32.totalorder %s232_s0, %s853_s22  ;;  %s858_s7 = sshll.u32 %s1019_s5, 4  ;;  %s859_s7 = int_to_ptr.vmem [resolvable:$false] %s858_s7 }
  0x4a   : > { %s860_s26 = scalar_lea.vmem %s859_s7, 64  ;;  %p861_p8 = scmp.lt.s32.totalorder %s232_s0, %s859_s7 }
  0x4b   : > { %p856_p1 = pnand %p854_p9, %p810_p3  ;;  %p862_p11 = scmp.lt.s32.totalorder %s860_s26, %s853_s22 }
  0x4d   : > { %p857_p6 = pneg %p856_p1  ;;  %p863_p2 = por %p862_p11, %p861_p8 }
  0x4f   : > { %p864_p5 = pnand %p863_p2, %p857_p6 }
  0x51   : > { %867 = shalt.err (!%p864_p5)
}
  0x52   : > { %734 = dma.hbm_to_vmem [thread:$0]  (!%p1133_p0), %s1178_s6, 32, %s232_s0, %s220_s10  }
  0x53   : > { %p1425_p13 = scmp.ne.s32.totalorder %s1424_s9, 0 }
  0x54   : > { %s1203_s12 = sand.u32 (!%p1425_p13), 1, %s998_s16   ;;  %p1426_p3 = scmp.ne.s32.totalorder (!%p1425_p13), %s1418_s27, 0 }
  0x55   : > { %240 = sbr.rel (%p1425_p13) target bundleno = 216 (0xd8), region = 28  ;;  %s700_s14 = sshll.u32 (!%p1425_p13), %s1203_s12, 3 }
  0x56   : > { %s243_s24 = scalar_lea.sflag (!%p1425_p13), [#allocation3], %s1203_s12  ;;  %s246_s25 = scalar_lea.vmem (!%p1425_p13), [#allocation2], %s700_s14 }
  0x5c   : > { %977 = dma.done.wait (%p1426_p3), %s243_s24, 128  }
  0x5d   : > { %979 = vsyncadd (%p1426_p3), %s243_s24, 4294967168  ;;  %s701_s0 = sshll.u32 %s1203_s12, 1  ;;  %s252_s13 = scalar_lea.sflag [#allocation6], %s1203_s12 }
  0x5e   : > { %s255_s9 = scalar_lea.vmem [#allocation5], %s701_s0 }
  0x5f   : > { %981 = dma.done.wait (%p1426_p3), %s252_s13, 32  }
  0x60   : > { %983 = vsyncadd (%p1426_p3), %s252_s13, 4294967264  ;;  %vm300_vm0 = vcmask 1041408   ;;  %v295_v0 = vld [vmem:[%s246_s25] sm:$0x3]  ;;  %v296_v1 = vld [vmem:[%s246_s25 + $0x2] sm:$0x3] }
  0x61   : > { %v297_v2 = vld [vmem:[%s246_s25 + $0x4] sm:$0x3]  ;;  %v298_v3 = vld [vmem:[%s246_s25 + $0x6] sm:$0x3]  ;;  %v1217_v4 = vld [vmem:[%s255_s9] sm:$0x3] }
  0x62   : > { %v301_v5 = vsel %vm300_vm0, %v295_v0, -inf  ;;  %v302_v6 = vsel %vm300_vm0, %v296_v1, -inf  ;;  %v303_v7 = vsel %vm300_vm0, %v297_v2, -inf  ;;  %v304_v8 = vsel %vm300_vm0, %v298_v3, -inf  ;;  %s1240_s27 = sshll.u32 %s1203_s12, 2  ;;  %s474_s11 = sand.u32 1, %s1080_s21  }
  0x63   : > { %v305_v9 = vmax.f32 %v301_v5, %v302_v6  ;;  %v306_v10 = vmax.f32 %v303_v7, %v304_v8  ;;  %vm332_vm1 = vcmp.eq.s32.totalorder %v1217_v4, 0  ;;  %vm333_vm2 = vcmp.eq.s32.totalorder %v1217_v4, 1  ;;  %s294_s6 = scalar_lea.vmem [#allocation10], %s1240_s27  ;;  %s287_s10 = scalar_lea.vmem [#allocation8], %s1240_s27 }
  0x64   : > { %vm334_vm3 = vcmp.eq.s32.totalorder %v1217_v4, 2  ;;  %vm335_vm4 = vcmp.eq.s32.totalorder %v1217_v4, 3  ;;  %v1020_v11 = vmov 0.0   ;;  %vm443_vm5 = vcmask 1041409   ;;  %s508_s8 = sshll.u32 %s287_s10, 4  ;;  %s1274_s22 = sshll.u32 %s1006_s18, 6  ;;  %s1279_s8 = int_to_ptr.vmem [resolvable:$true] %s508_s8 }
  0x65   : > { %v705_v12 = vsel %vm332_vm1, 1.0, %v1020_v11  ;;  %v706_v13 = vsel %vm333_vm2, 1.0, %v1020_v11  ;;  %v707_v14 = vsel %vm334_vm3, 1.0, %v1020_v11  ;;  %v307_v15 = vmax.f32 %v305_v9, %v306_v10  ;;  %s522_s5 = sshll.u32 %s294_s6, 4  ;;  %s280_s7 = scalar_lea.vmem [#allocation7], %s1240_s27  ;;  %s1292_s5 = int_to_ptr.vmem [resolvable:$true] %s522_s5 }
  0x66   : > { %v708_v16 = vsel %vm335_vm4, 1.0, %v1020_v11  ;;  %v411_v17 = vsel %vm300_vm0, %v705_v12, 0.0  ;;  %v418_v18 = vsel %vm300_vm0, %v706_v13, 0.0  ;;  %v425_v21 = vsel %vm300_vm0, %v707_v14, 0.0  ;;  %s494_s26 = sshll.u32 %s280_s7, 4  ;;  %s1289_s14 = scalar_lea.hbm %s1411_s3, %s1274_s22  ;;  %s1302_s26 = int_to_ptr.vmem [resolvable:$true] %s494_s26 }
  0x67   : > { %v412_v19 = vrot.slane %v411_v17, 4  ;;  %v419_v20 = vrot.slane %v418_v18, 4  ;;  %v432_v22 = vsel %vm300_vm0, %v708_v16, 0.0  ;;  %v308_v23 = vsub.f32 %v295_v0, %v307_v15  ;;  %s1298_s0 = scalar_lea.hbm %s1412_s4, %s1274_s22  ;;  %s1304_s13 = scalar_lea.sflag [#allocation9], %s474_s11 }
  0x68   : > { %v309_v24 = vsub.f32 %v296_v1, %v307_v15  ;;  %v310_v25 = vsub.f32 %v297_v2, %v307_v15  ;;  %v311_v26 = vsub.f32 %v298_v3, %v307_v15  ;;  %v426_v29 = vrot.slane %v425_v21, 4  ;;  %s868_s9 = scalar_lea.vmem %s1279_s8, 64  ;;  %p1427_p0 = scmp.ne.s32.totalorder %s1419_s28, 0 }
  0x69   : > { %v413_v27 = vadd.f32 %v412_v19, %v411_v17  ;;  %v420_v28 = vadd.f32 %v419_v20, %v418_v18  ;;  %v433_v30 = vrot.slane %v432_v22, 4  ;;  %v312_v31 = vmul.f32 1.442695, %v308_v23  ;;  %p869_p8 = scmp.ne.s32.totalorder %s1279_s8, %s868_s9 }
  0x6a   : > { %v314_v32 = vmul.f32 1.442695, %v309_v24  ;;  %v316_v33 = vmul.f32 1.442695, %v310_v25  ;;  %v318_v34 = vmul.f32 1.442695, %v311_v26  ;;  %v427_v37 = vadd.f32 %v426_v29, %v425_v21 }
  0x6b   : > { %v414_v35 = vrot.slane %v413_v27, 2  ;;  %v421_v36 = vrot.slane %v420_v28, 2  ;;  %798 = vpow2.f32 %v312_v31  ;;  %v434_v38 = vadd.f32 %v433_v30, %v432_v22  ;;  %p870_p11 = pnand %p869_p8, %p1427_p0 }
  0x6c   : > { %800 = vpow2.f32 %v314_v32  ;;  %v428_v41 = vrot.slane %v427_v37, 2  ;;  %vm445_vm6 = vcmask 1042434   ;;  %vm447_vm7 = vcmask 1043459  }
  0x6d   : > { %v415_v39 = vadd.f32 %v414_v35, %v413_v27  ;;  %v422_v40 = vadd.f32 %v421_v36, %v420_v28  ;;  %802 = vpow2.f32 %v316_v33  ;;  %v435_v42 = vrot.slane %v434_v38, 2  ;;  %p871_p4 = pneg %p870_p11 }
  0x6e   : > { %804 = vpow2.f32 %v318_v34  ;;  %v429_v45 = vadd.f32 %v428_v41, %v427_v37  ;;  %vm336_vm8 = vcmp.ge.s32.totalorder %v1217_v4, 0 }
  0x6f   : > { %v416_v43 = vrot.slane %v415_v39, 1  ;;  %v423_v44 = vrot.slane %v422_v40, 1  ;;  %v436_v46 = vadd.f32 %v435_v42, %v434_v38 }
  0x70   : > { %v430_v49 = vrot.slane %v429_v45, 1 }
  0x71   : > { %v417_v47 = vadd.f32 %v416_v43, %v415_v39  ;;  %v424_v48 = vadd.f32 %v423_v44, %v422_v40  ;;  %v437_v50 = vrot.slane %v436_v46, 1 }
  0x72   : > { %v431_v51 = vadd.f32 %v430_v49, %v429_v45 }
  0x73   : > { %v464_v52 = vsel %vm443_vm5, %v424_v48, %v417_v47  ;;  %v438_v53 = vadd.f32 %v437_v50, %v436_v46 }
  0x74   : > { %v465_v54 = vsel %vm445_vm6, %v431_v51, %v464_v52 }
  0x75   : > { %v799_v55 = vpop.eup %798  ;;  %v466_v56 = vsel %vm447_vm7, %v438_v53, %v465_v54 }
  0x76   : > { %v801_v57 = vpop.eup %800  ;;  %v320_v58 = vsel %vm300_vm0, %v799_v55, 0.0  ;;  %468 = vst [vmem:[%s294_s6] sm:$0xf] %v466_v56  ;;  %s1021_s6 = smov [#allocation8]  }
  0x77   : > { %v803_v59 = vpop.eup %802  ;;  %v321_v60 = vsel %vm300_vm0, %v801_v57, 0.0  ;;  %s872_s18 = sshll.u32 %s1021_s6, 4  ;;  %s873_s18 = int_to_ptr.vmem [resolvable:$false] %s872_s18 }
  0x78   : > { %v805_v61 = vpop.eup %804  ;;  %v322_v62 = vadd.f32 %v321_v60, %v320_v58  ;;  %v323_v63 = vsel %vm300_vm0, %v803_v59, 0.0  ;;  %s874_s21 = scalar_lea.vmem %s873_s18, 128  ;;  %p875_p7 = scmp.lt.s32.totalorder %s1279_s8, %s873_s18 }
  0x79   : > { %v325_v0 = vsel %vm300_vm0, %v805_v61, 0.0  ;;  %p876_p10 = scmp.lt.s32.totalorder %s874_s21, %s868_s9 }
  0x7a   : > { %v324_v1 = vadd.f32 %v323_v63, %v322_v62 }
  0x7b   : > { %p877_p12 = por %p876_p10, %p875_p7 }
  0x7c   : > { %v326_v2 = vadd.f32 %v325_v0, %v324_v1 }
  0x7d   : > { %p878_p9 = pnand %p877_p12, %p871_p4 }
  0x7e   : > { %806 = vrcp.f32 %v326_v2 }
  0x88   : > { %v807_v3 = vpop.eup %806 }
  0x89   : > { %v328_v5 = vmul.f32 %v807_v3, %v799_v55  ;;  %v329_v6 = vmul.f32 %v807_v3, %v801_v57  ;;  %v330_v7 = vmul.f32 %v807_v3, %v803_v59  ;;  %v331_v8 = vmul.f32 %v807_v3, %v805_v61 }
  0x8b   : > { %v371_v9 = vsel %vm336_vm8, %v328_v5, 0.0  ;;  %v372_v10 = vsel %vm336_vm8, %v329_v6, 0.0  ;;  %v373_v11 = vsel %vm336_vm8, %v330_v7, 0.0  ;;  %v374_v12 = vsel %vm336_vm8, %v331_v8, 0.0 }
  0x8c   : > { %v375_v13 = vsel %vm300_vm0, %v371_v9, 0.0  ;;  %v382_v14 = vsel %vm300_vm0, %v372_v10, 0.0  ;;  %v389_v15 = vsel %vm300_vm0, %v373_v11, 0.0  ;;  %v396_v16 = vsel %vm300_vm0, %v374_v12, 0.0 }
  0x8d   : > { %v376_v17 = vrot.slane %v375_v13, 4  ;;  %v383_v18 = vrot.slane %v382_v14, 4  ;;  %v390_v19 = vrot.slane %v389_v15, 4  ;;  %v397_v20 = vrot.slane %v396_v16, 4 }
  0x8e   : > { %v337_v21 = vsel %vm332_vm1, %v328_v5, 0.0  ;;  %v338_v22 = vsel %vm333_vm2, %v329_v6, 0.0  ;;  %v339_v23 = vsel %vm334_vm3, %v330_v7, 0.0  ;;  %v340_v24 = vsel %vm335_vm4, %v331_v8, 0.0 }
  0x8f   : > { %v377_v25 = vadd.f32 %v376_v17, %v375_v13  ;;  %v384_v26 = vadd.f32 %v383_v18, %v382_v14  ;;  %v391_v27 = vadd.f32 %v390_v19, %v389_v15  ;;  %v398_v28 = vadd.f32 %v397_v20, %v396_v16 }
  0x90   : > { %v341_v29 = vsel %vm300_vm0, %v337_v21, 0.0  ;;  %v348_v30 = vsel %vm300_vm0, %v338_v22, 0.0  ;;  %v355_v31 = vsel %vm300_vm0, %v339_v23, 0.0  ;;  %v362_v32 = vsel %vm300_vm0, %v340_v24, 0.0 }
  0x91   : > { %v378_v33 = vrot.slane %v377_v25, 2  ;;  %v385_v34 = vrot.slane %v384_v26, 2  ;;  %v392_v35 = vrot.slane %v391_v27, 2  ;;  %v399_v36 = vrot.slane %v398_v28, 2 }
  0x92   : > { %v342_v37 = vrot.slane %v341_v29, 4  ;;  %v349_v4 = vrot.slane %v348_v30, 4  ;;  %v356_v38 = vrot.slane %v355_v31, 4  ;;  %v363_v39 = vrot.slane %v362_v32, 4 }
  0x93   : > { %v379_v40 = vadd.f32 %v378_v33, %v377_v25  ;;  %v386_v41 = vadd.f32 %v385_v34, %v384_v26  ;;  %v393_v42 = vadd.f32 %v392_v35, %v391_v27  ;;  %v400_v43 = vadd.f32 %v399_v36, %v398_v28 }
  0x94   : > { %v343_v44 = vadd.f32 %v342_v37, %v341_v29  ;;  %v350_v45 = vadd.f32 %v349_v4, %v348_v30  ;;  %v357_v46 = vadd.f32 %v356_v38, %v355_v31  ;;  %v364_v47 = vadd.f32 %v363_v39, %v362_v32 }
  0x95   : > { %v380_v48 = vrot.slane %v379_v40, 1  ;;  %v387_v49 = vrot.slane %v386_v41, 1  ;;  %v394_v50 = vrot.slane %v393_v42, 1  ;;  %v401_v51 = vrot.slane %v400_v43, 1 }
  0x96   : > { %v344_v52 = vrot.slane %v343_v44, 2  ;;  %v351_v53 = vrot.slane %v350_v45, 2  ;;  %v358_v54 = vrot.slane %v357_v46, 2  ;;  %v365_v55 = vrot.slane %v364_v47, 2 }
  0x97   : > { %v381_v56 = vadd.f32 %v380_v48, %v379_v40  ;;  %v388_v57 = vadd.f32 %v387_v49, %v386_v41  ;;  %v395_v58 = vadd.f32 %v394_v50, %v393_v42  ;;  %v402_v59 = vadd.f32 %v401_v51, %v400_v43 }
  0x98   : > { %v345_v60 = vadd.f32 %v344_v52, %v343_v44  ;;  %v352_v61 = vadd.f32 %v351_v53, %v350_v45  ;;  %v359_v62 = vadd.f32 %v358_v54, %v357_v46  ;;  %v366_v63 = vadd.f32 %v365_v55, %v364_v47 }
  0x99   : > { %v455_v0 = vsel %vm443_vm5, %v388_v57, %v381_v56 }
  0x9a   : > { %v456_v1 = vsel %vm445_vm6, %v395_v58, %v455_v0  ;;  %v346_v2 = vrot.slane %v345_v60, 1  ;;  %v353_v3 = vrot.slane %v352_v61, 1  ;;  %v360_v5 = vrot.slane %v359_v62, 1 }
  0x9b   : > { %v457_v6 = vsel %vm447_vm7, %v402_v59, %v456_v1  ;;  %v367_v7 = vrot.slane %v366_v63, 1 }
  0x9c   : > { %459 = vst [vmem:[%s287_s10] sm:$0xf] %v457_v6  ;;  %v347_v8 = vadd.f32 %v346_v2, %v345_v60  ;;  %v354_v9 = vadd.f32 %v353_v3, %v352_v61  ;;  %v361_v10 = vadd.f32 %v360_v5, %v359_v62 }
  0x9d   : > { %v368_v11 = vadd.f32 %v367_v7, %v366_v63 }
  0x9e   : > { %881 = shalt.err (!%p878_p9)
}
  0x9f   : > { %s882_s10 = scalar_lea.hbm %s1289_s14, 64  ;;  %s886_s25 = scalar_lea.hbm %s1411_s3, 128 }
  0xa0   : > { %p883_p1 = scmp.ne.s32.totalorder %s1289_s14, %s882_s10  ;;  %p887_p5 = scmp.lt.u32.totalorder %s1289_s14, %s1411_s3 }
  0xa1   : > { %p888_p13 = scmp.lt.u32.totalorder %s886_s25, %s882_s10  ;;  %p890_p8 = scmp.lt.u32.totalorder %s882_s10, %s1289_s14 }
  0xa2   : > { %p884_p6 = pnand %p883_p1, %p1427_p0 }
  0xa3   : > { %p889_p3 = por %p888_p13, %p887_p5 }
  0xa4   : > { %p885_p2 = pneg %p884_p6 }
  0xa5   : > { %p891_p11 = por %p890_p8, %p889_p3 }
  0xa7   : > { %p892_p4 = pnand %p891_p11, %p885_p2 }
  0xa9   : > { %895 = shalt.err (!%p892_p4)
}
  0xaa   : > { %723 = dma.vmem_to_hbm [thread:$0]  (%p1427_p0), %s1279_s8, 64, %s1289_s14, %s1304_s13   ;;  %v444_v12 = vsel %vm443_vm5, %v354_v9, %v347_v8 }
  0xab   : > { %s896_s9 = scalar_lea.vmem %s1292_s5, 64  ;;  %s1022_s21 = smov [#allocation10]  }
  0xac   : > { %p897_p7 = scmp.ne.s32.totalorder %s1292_s5, %s896_s9  ;;  %s900_s10 = sshll.u32 %s1022_s21, 4  ;;  %s901_s10 = int_to_ptr.vmem [resolvable:$false] %s900_s10 }
  0xad   : > { %s902_s11 = scalar_lea.vmem %s901_s10, 128  ;;  %p903_p9 = scmp.lt.s32.totalorder %s1292_s5, %s901_s10 }
  0xae   : > { %p898_p10 = pnand %p897_p7, %p1427_p0  ;;  %p904_p1 = scmp.lt.s32.totalorder %s902_s11, %s896_s9 }
  0xb0   : > { %p899_p12 = pneg %p898_p10  ;;  %p905_p6 = por %p904_p1, %p903_p9 }
  0xb2   : > { %p906_p2 = pnand %p905_p6, %p899_p12 }
  0xb4   : > { %909 = shalt.err (!%p906_p2)
}
  0xb5   : > { %s910_s8 = scalar_lea.hbm %s1298_s0, 64  ;;  %s914_s25 = scalar_lea.hbm %s1412_s4, 128 }
  0xb6   : > { %p911_p5 = scmp.ne.s32.totalorder %s1298_s0, %s910_s8  ;;  %p915_p8 = scmp.lt.u32.totalorder %s1298_s0, %s1412_s4 }
  0xb7   : > { %p916_p11 = scmp.lt.u32.totalorder %s914_s25, %s910_s8  ;;  %p918_p7 = scmp.lt.u32.totalorder %s910_s8, %s1298_s0 }
  0xb8   : > { %p912_p13 = pnand %p911_p5, %p1427_p0 }
  0xb9   : > { %p917_p4 = por %p916_p11, %p915_p8 }
  0xba   : > { %p913_p3 = pneg %p912_p13 }
  0xbb   : > { %p919_p10 = por %p918_p7, %p917_p4 }
  0xbd   : > { %p920_p12 = pnand %p919_p10, %p913_p3 }
  0xbf   : > { %923 = shalt.err (!%p920_p12)
}
  0xc0   : > { %724 = dma.vmem_to_hbm [thread:$0]  (%p1427_p0), %s1292_s5, 64, %s1298_s0, %s1304_s13   ;;  %v446_v13 = vsel %vm445_vm6, %v361_v10, %v444_v12 }
  0xc1   : > { %s1356_s10 = scalar_lea.hbm %s1410_s2, %s1274_s22  ;;  %v448_v14 = vsel %vm447_vm7, %v368_v11, %v446_v13  ;;  %s470_s11 = scalar_lea.sflag [#allocation4], %s1203_s12 }
  0xc2   : > { %450 = vst [vmem:[%s280_s7] sm:$0xf] %v448_v14  ;;  %s924_s8 = scalar_lea.vmem %s1302_s26, 64  ;;  %s1023_s14 = smov [#allocation7]  }
  0xc3   : > { %p925_p9 = scmp.ne.s32.totalorder %s1302_s26, %s924_s8  ;;  %s928_s24 = sshll.u32 %s1023_s14, 4  ;;  %s929_s24 = int_to_ptr.vmem [resolvable:$false] %s928_s24 }
  0xc4   : > { %s930_s5 = scalar_lea.vmem %s929_s24, 128  ;;  %p931_p2 = scmp.lt.s32.totalorder %s1302_s26, %s929_s24 }
  0xc5   : > { %p926_p1 = pnand %p925_p9, %p1427_p0  ;;  %p932_p5 = scmp.lt.s32.totalorder %s930_s5, %s924_s8 }
  0xc7   : > { %p927_p6 = pneg %p926_p1  ;;  %p933_p13 = por %p932_p5, %p931_p2 }
  0xc9   : > { %p934_p3 = pnand %p933_p13, %p927_p6 }
  0xcb   : > { %937 = shalt.err (!%p934_p3)
}
  0xcc   : > { %s938_s12 = scalar_lea.hbm %s1356_s10, 64  ;;  %s942_s7 = scalar_lea.hbm %s1410_s2, 128 }
  0xcd   : > { %p939_p8 = scmp.ne.s32.totalorder %s1356_s10, %s938_s12  ;;  %p943_p7 = scmp.lt.u32.totalorder %s1356_s10, %s1410_s2 }
  0xce   : > { %p944_p10 = scmp.lt.u32.totalorder %s942_s7, %s938_s12  ;;  %p946_p9 = scmp.lt.u32.totalorder %s938_s12, %s1356_s10 }
  0xcf   : > { %p940_p11 = pnand %p939_p8, %p1427_p0 }
  0xd0   : > { %p945_p12 = por %p944_p10, %p943_p7 }
  0xd1   : > { %p941_p4 = pneg %p940_p11 }
  0xd2   : > { %p947_p1 = por %p946_p9, %p945_p12 }
  0xd4   : > { %p948_p6 = pnand %p947_p1, %p941_p4 }
  0xd6   : > { %951 = shalt.err (!%p948_p6)
}
  0xd7   : > { %722 = dma.vmem_to_hbm [thread:$0]  (%p1427_p0), %s1302_s26, 64, %s1356_s10, %s470_s11  }
  0xd8 PF: > { %s534_s25 = sand.u32 1, %s994_s15   ;;  %p1428_p2 = scmp.ne.s32.totalorder %s1420_s30, 0 }
  0xd9   : > { %p1429_p5 = scmp.ge.s32.totalorder %s1014_s20, 2  ;;  %s535_s6 = scalar_lea.sflag [#allocation4], %s534_s25 }
  0xdb   : > { %p736_p13 = pnand %p1429_p5, %p1428_p2 }
  0xdd   : > { %985 = dma.done.wait (!%p736_p13), %s535_s6, 64  }
  0xde   : > { %987 = vsyncadd (!%p736_p13), %s535_s6, 4294967232  ;;  %s1430_s18 = sadd.s32 4294967294, %s1014_s20  }
  0xdf   : > { %s543_s9 = sand.u32 1, %s1430_s18  }
  0xe0   : > { %s544_s21 = scalar_lea.sflag [#allocation9], %s543_s9 }
  0xe1   : > { %989 = dma.done.wait (!%p736_p13), %s544_s21, 128  }
  0xe2   : > { %991 = vsyncadd (!%p736_p13), %s544_s21, 4294967168  ;;  %s27_s20 = sadd.s32 1, %s1014_s20   ;;  %s1431_s15 = smov %s998_s16 }
  0xe3   : > { %p24_p0 = scmp.ge.s32.totalorder %s27_s20, 4   ;;  %s1432_s16 = smov %s1002_s17 }
  0xe4   : > { %s1433_s17 = smov %s1111_s29  ;;  %s1434_s18 = smov %s1010_s19 }
  0xe5   : > { %s1435_s19 = smov %s1437_s23  ;;  %26 = sbr.rel (!%p24_p0) target bundleno = 12 (0xc), region = 118 }
  0xec   :  { %558 = vsyncpa [#allocation3], 1 }
  0xed   :  { %560 = vsyncpa [#allocation3 + $0x1], 1 }
  0xee   :  { %561 = vsyncpa [#allocation6], 1 }
  0xef   :  { %563 = vsyncpa [#allocation6 + $0x1], 1 }
  0xf0   :  { %564 = vsyncpa [#allocation4], 1 }
  0xf1   :  { %566 = vsyncpa [#allocation4 + $0x1], 1 }
  0xf2   :  { %567 = vsyncpa [#allocation9], 1 }
  0xf3   :  { %569 = vsyncpa [#allocation9 + $0x1], 1 }

</bundles_post_ra>
